<compile_context>
chip_gen: v5e
topology: v5e:2x2
jax: 0.10.0
libtpu: 0.0.40
codegen_flags: <defaults>
</compile_context>

<pallas_src>
import jax
import jax.numpy as jnp
from jax.experimental import pallas as pl
from jax.experimental.pallas import tpu as pltpu

LANE = 128  # TPU lane width


def _round_up(x, m):
    return ((x + m - 1) // m) * m


def _patch_embed_kernel(x_ref, w_ref, b_ref, o_ref):
    # x_ref: (tm, K) bf16 patch vectors, w_ref: (K, E_pad) bf16,
    # b_ref: (1, E_pad) f32, o_ref: (tm, E_pad) f32
    acc = jnp.dot(x_ref[...], w_ref[...], preferred_element_type=jnp.float32)
    o_ref[...] = (acc + b_ref[...]).astype(o_ref.dtype)


def prepare_patch_embed_params(weight, bias, compute_dtype=jnp.bfloat16):
    """One-time (init-time) param prep: Conv3d weight (E, C, ts, ph, pw) ->
    lane-padded (K, E_pad) bf16 matmul weight and (1, E_pad) f32 bias."""
    E = weight.shape[0]
    K = weight.size // E
    E_pad = _round_up(E, LANE)
    w_mat = weight.reshape(E, K).T.astype(compute_dtype)          # (K, E)
    w_mat = jnp.pad(w_mat, ((0, 0), (0, E_pad - E)))              # (K, E_pad)
    b_mat = bias.astype(jnp.float32).reshape(1, E)
    b_mat = jnp.pad(b_mat, ((0, 0), (0, E_pad - E)))              # (1, E_pad)
    return w_mat, b_mat


def patch_embed_forward(x, w_mat, b_mat, *, embed_dim, tubelet_size, patch_size,
                        compute_dtype=jnp.bfloat16):
    """x: (B, C, T, H, W), w_mat/b_mat from prepare_patch_embed_params.
    Returns PyTorch Conv3d-layout output (B, E, T//ts, H//ph, W//pw)."""
    B, C, T, H, W = x.shape
    ts = tubelet_size
    ph, pw = patch_size
    Tn, Hn, Wn = T // ts, H // ph, W // pw
    K, E_pad = w_mat.shape
    E = embed_dim
    M = B * Tn * Hn * Wn

    # ---- glue: extract non-overlapping 3D patches (cast to bf16 FIRST so the
    # materialized patch intermediate carries half the HBM traffic) ----
    xp = x.astype(compute_dtype).reshape(B, C, Tn, ts, Hn, ph, Wn, pw)
    xp = xp.transpose(0, 2, 4, 6, 1, 3, 5, 7)          # (B, Tn, Hn, Wn, C, ts, ph, pw)
    patches = xp.reshape(M, K)

    # ---- tile sizing: big M tile, sublane (8) aligned, tail padded ----
    tm = min(512, _round_up(M, 8))
    M_pad = _round_up(M, tm)
    if M_pad != M:
        patches = jnp.pad(patches, ((0, M_pad - M), (0, 0)))

    grid = (M_pad // tm,)
    cost = pl.CostEstimate(
        flops=2 * M_pad * K * E_pad,
        transcendentals=0,
        bytes_accessed=int(M_pad * K * patches.dtype.itemsize
                           + K * E_pad * w_mat.dtype.itemsize
                           + M_pad * E_pad * jnp.dtype(x.dtype).itemsize),
    )

    out = pl.pallas_call(
        _patch_embed_kernel,
        out_shape=jax.ShapeDtypeStruct((M_pad, E_pad), x.dtype),
        grid_spec=pltpu.PrefetchScalarGridSpec(
            num_scalar_prefetch=0,
            grid=grid,
            in_specs=[
                pl.BlockSpec((tm, K), lambda i: (i, 0)),
                # constant index_map -> DMA'd once, stays resident in VMEM
                pl.BlockSpec((K, E_pad), lambda i: (0, 0)),
                pl.BlockSpec((1, E_pad), lambda i: (0, 0)),
            ],
            out_specs=pl.BlockSpec((tm, E_pad), lambda i: (i, 0)),
        ),
        compiler_params=pltpu.CompilerParams(
            dimension_semantics=("parallel",),
        ),
        cost_estimate=cost,
    )(patches, w_mat, b_mat)

    # ---- glue: strip padding, back to PyTorch Conv3d output layout ----
    out = out[:M, :E]
    out = out.reshape(B, Tn, Hn, Wn, E).transpose(0, 4, 1, 2, 3)
    return out


if __name__ == "__main__":
    # Small config consistent with PatchEmbed(img_size=16, patch_size=8,
    # in_chans=4, embed_dim=32, num_frames=4, tubelet_size=2)
    B, C, T, H, W = 2, 4, 4, 16, 16
    E = 32
    ts, ph, pw = 2, 8, 8

    key = jax.random.PRNGKey(0)
    kx, kw, kb = jax.random.split(key, 3)
    x = jax.random.normal(kx, (B, C, T, H, W), dtype=jnp.float32)
    weight = 0.02 * jax.random.normal(kw, (E, C, ts, ph, pw), dtype=jnp.float32)
    bias = 0.01 * jax.random.normal(kb, (E,), dtype=jnp.float32)

    # One-time param prep (hoisted out of the per-call path).
    w_mat, b_mat = prepare_patch_embed_params(weight, bias)

    fwd = jax.jit(lambda xx, ww, bb: patch_embed_forward(
        xx, ww, bb, embed_dim=E, tubelet_size=ts, patch_size=(ph, pw)))
    out = jax.block_until_ready(fwd(x, w_mat, b_mat))

    # Reference: plain-JAX f32 strided Conv3d-as-matmul (bf16-appropriate tolerance).
    xp = x.reshape(B, C, T // ts, ts, H // ph, ph, W // pw, pw)
    xp = xp.transpose(0, 2, 4, 6, 1, 3, 5, 7).reshape(-1, C * ts * ph * pw)
    ref = (xp @ weight.reshape(E, -1).T + bias).reshape(
        B, T // ts, H // ph, W // pw, E).transpose(0, 4, 1, 2, 3)

    assert out.shape == (B, E, T // ts, H // ph, W // pw)
    max_err = float(jnp.max(jnp.abs(out - ref)))
    assert jnp.allclose(out, ref, atol=2e-2, rtol=2e-2), max_err

    print("KERNEL_OK")
</pallas_src>

<mosaic_0001>
module attributes {stable_mosaic.version = 11 : i64} {
  func.func @_patch_embed_kernel(%arg0: i32, %arg1: memref<16x512xbf16, #tpu.memory_space<vmem>>, %arg2: memref<512x128xbf16, #tpu.memory_space<vmem>>, %arg3: memref<1x128xf32, #tpu.memory_space<vmem>>, %arg4: memref<16x128xf32, #tpu.memory_space<vmem>>) attributes {dimension_semantics = [#tpu.dimension_semantics<parallel>], iteration_bounds = array<i64: 1>, scalar_prefetch = 0 : i64, scratch_operands = 0 : i64, tpu.core_type = #tpu.core_type<tc>, window_params = [{transform_indices = @transform_0, window_bounds = array<i64: 16, 512>}, {pipeline_mode = #tpu.pipeline_mode<synchronous>, transform_indices = @transform_1, window_bounds = array<i64: 512, 128>}, {pipeline_mode = #tpu.pipeline_mode<synchronous>, transform_indices = @transform_2, window_bounds = array<i64: 1, 128>}, {transform_indices = @transform_3, window_bounds = array<i64: 16, 128>}]} {
    %c0 = arith.constant 0 : index
    %c0_0 = arith.constant 0 : index
    %0 = vector.load %arg1[%c0, %c0_0] : memref<16x512xbf16, #tpu.memory_space<vmem>>, vector<16x512xbf16>
    %c0_1 = arith.constant 0 : index
    %c0_2 = arith.constant 0 : index
    %1 = vector.load %arg2[%c0_1, %c0_2] : memref<512x128xbf16, #tpu.memory_space<vmem>>, vector<512x128xbf16>
    %cst = arith.constant dense<0.000000e+00> : vector<16x128xf32>
    %2 = tpu.matmul %0, %1, %cst {dimension_numbers = #tpu.dot_dimension_numbers<[1], [0], [0], [1], [0, 0, 1, 1], [], []>} : vector<16x512xbf16>, vector<512x128xbf16>, vector<16x128xf32> -> vector<16x128xf32>
    %c0_3 = arith.constant 0 : index
    %c0_4 = arith.constant 0 : index
    %3 = vector.load %arg3[%c0_3, %c0_4] : memref<1x128xf32, #tpu.memory_space<vmem>>, vector<1x128xf32>
    %4 = vector.broadcast %3 : vector<1x128xf32> to vector<16x128xf32>
    %5 = arith.addf %2, %4 : vector<16x128xf32>
    %c0_5 = arith.constant 0 : index
    %c0_6 = arith.constant 0 : index
    %6 = vector.load %arg4[%c0_5, %c0_6] : memref<16x128xf32, #tpu.memory_space<vmem>>, vector<16x128xf32>
    tpu.vector_store %arg4[%c0_5, %c0_6], %5 {strides = array<i32>} : memref<16x128xf32, #tpu.memory_space<vmem>>, vector<16x128xf32>,
    return
  }
  func.func @transform_0(%arg0: i32) -> (i32, i32) {
    %c0_i32 = arith.constant 0 : i32
    %c0_i32_0 = arith.constant 0 : i32
    return %arg0, %c0_i32 : i32, i32
  }
  func.func @transform_1(%arg0: i32) -> (i32, i32) {
    %c0_i32 = arith.constant 0 : i32
    %c0_i32_0 = arith.constant 0 : i32
    %c0_i32_1 = arith.constant 0 : i32
    return %c0_i32, %c0_i32_0 : i32, i32
  }
  func.func @transform_2(%arg0: i32) -> (i32, i32) {
    %c0_i32 = arith.constant 0 : i32
    %c0_i32_0 = arith.constant 0 : i32
    %c0_i32_1 = arith.constant 0 : i32
    return %c0_i32, %c0_i32_0 : i32, i32
  }
  func.func @transform_3(%arg0: i32) -> (i32, i32) {
    %c0_i32 = arith.constant 0 : i32
    %c0_i32_0 = arith.constant 0 : i32
    return %arg0, %c0_i32 : i32, i32
  }
}

</mosaic_0001>

<bundles_post_ra>
// kernel: _lambda_.1
= control target key start
LH: loop header
LB: loop body
LE: loop exit
PB: predicated region body
PF: predicated region fallthrough
CT: control target
= control target key end

     0   :  { %s734_s0 = inlined_call_operand.vmem [shape: bf16[16,512], index: 0, kind: input, shape index: {}]   ;;  %s735_s1 = inlined_call_operand.vmem [shape: bf16[512,128], index: 1, kind: input, shape index: {}]   ;;  %s736_s2 = inlined_call_operand.vmem [shape: f32[1,128], index: 2, kind: input, shape index: {}]   ;;  %s737_s3 = inlined_call_operand.hbm [shape: f32[16,128], index: 3, kind: output, shape index: {}]  }
   0x1   :  { %v530_v0 = vld [vmem:[%s735_s1 + $0x38] sm:$0xff]  ;;  %v529_v4 = vld [vmem:[%s735_s1 + $0x30] sm:$0xff]  ;;  %v528_v8 = vld [vmem:[%s735_s1 + $0x28] sm:$0xff] }
   0x2   :  { %v538_v1 = vld [vmem:[%s735_s1 + $0x78] sm:$0xff]  ;;  %299 = vmatpush.bf16.msra.mxu0 %v530_v0  ;;  %v537_v5 = vld [vmem:[%s735_s1 + $0x70] sm:$0xff]  ;;  %v536_v9 = vld [vmem:[%s735_s1 + $0x68] sm:$0xff] }
   0x3   :  { %v546_v2 = vld [vmem:[%s735_s1 + $0xb8] sm:$0xff]  ;;  %313 = vmatpush.bf16.msra.mxu1 %v538_v1  ;;  %v545_v6 = vld [vmem:[%s735_s1 + $0xb0] sm:$0xff]  ;;  %v544_v10 = vld [vmem:[%s735_s1 + $0xa8] sm:$0xff] }
   0x4   :  { %v554_v3 = vld [vmem:[%s735_s1 + $0xf8] sm:$0xff]  ;;  %327 = vmatpush.bf16.msra.mxu2 %v546_v2  ;;  %v553_v7 = vld [vmem:[%s735_s1 + $0xf0] sm:$0xff]  ;;  %v552_v11 = vld [vmem:[%s735_s1 + $0xe8] sm:$0xff] }
   0x5   :  { %341 = vmatpush.bf16.msra.mxu3 %v554_v3  ;;  %v527_v12 = vld [vmem:[%s735_s1 + $0x20] sm:$0xff]  ;;  %v526_v16 = vld [vmem:[%s735_s1 + $0x18] sm:$0xff] }
   0x6   :  { %300 = vmatpush.bf16.msra.mxu0 %v529_v4  ;;  %v535_v13 = vld [vmem:[%s735_s1 + $0x60] sm:$0xff]  ;;  %v534_v17 = vld [vmem:[%s735_s1 + $0x58] sm:$0xff] }
   0x7   :  { %314 = vmatpush.bf16.msra.mxu1 %v537_v5  ;;  %v543_v14 = vld [vmem:[%s735_s1 + $0xa0] sm:$0xff] }
   0x8   :  { %328 = vmatpush.bf16.msra.mxu2 %v545_v6  ;;  %v551_v15 = vld [vmem:[%s735_s1 + $0xe0] sm:$0xff] }
   0x9   :  { %342 = vmatpush.bf16.msra.mxu3 %v553_v7 }
   0xa   :  { %301 = vmatpush.bf16.msra.mxu0 %v528_v8 }
   0xb   :  { %315 = vmatpush.bf16.msra.mxu1 %v536_v9 }
   0xc   :  { %329 = vmatpush.bf16.msra.mxu2 %v544_v10 }
   0xd   :  { %343 = vmatpush.bf16.msra.mxu3 %v552_v11 }
   0xe   :  { %302 = vmatpush.bf16.msra.mxu0 %v527_v12 }
   0xf   :  { %316 = vmatpush.bf16.msra.mxu1 %v535_v13 }
  0x10   :  { %8 = vsyncpa [#allocation3], 0  ;;  %330 = vmatpush.bf16.msra.mxu2 %v543_v14  ;;  %v542_v18 = vld [vmem:[%s735_s1 + $0x98] sm:$0xff]  ;;  %v525_v20 = vld [vmem:[%s735_s1 + $0x10] sm:$0xff]  ;;  %s363_s15 = sshll.u32 %s737_s3, 4  ;;  %s587_s16 = smov 8   ;;  %s364_s15 = int_to_ptr.hbm [resolvable:$true] %s363_s15 }
  0x11   :  { %344 = vmatpush.bf16.msra.mxu3 %v551_v15  ;;  %v550_v19 = vld [vmem:[%s735_s1 + $0xd8] sm:$0xff]  ;;  %v533_v21 = vld [vmem:[%s735_s1 + $0x50] sm:$0xff]  ;;  %v524_v24 = vld [vmem:[%s735_s1 + $0x8] sm:$0xff] }
  0x12   :  { %303 = vmatpush.bf16.msra.mxu0 %v526_v16  ;;  %v541_v22 = vld [vmem:[%s735_s1 + $0x90] sm:$0xff]  ;;  %v532_v25 = vld [vmem:[%s735_s1 + $0x48] sm:$0xff]  ;;  %v523_v28 = vld [vmem:[%s735_s1] sm:$0xff] }
  0x13   :  { %317 = vmatpush.bf16.msra.mxu1 %v534_v17  ;;  %v549_v23 = vld [vmem:[%s735_s1 + $0xd0] sm:$0xff]  ;;  %v540_v26 = vld [vmem:[%s735_s1 + $0x88] sm:$0xff]  ;;  %v531_v29 = vld [vmem:[%s735_s1 + $0x40] sm:$0xff] }
  0x14   :  { %331 = vmatpush.bf16.msra.mxu2 %v542_v18  ;;  %v548_v27 = vld [vmem:[%s735_s1 + $0xc8] sm:$0xff]  ;;  %v539_v30 = vld [vmem:[%s735_s1 + $0x80] sm:$0xff]  ;;  %v521_v33 = vld [vmem:[%s734_s0 + $0xc] sm:$0xf0] }
  0x15   :  { %345 = vmatpush.bf16.msra.mxu3 %v550_v19  ;;  %v547_v31 = vld [vmem:[%s735_s1 + $0xc0] sm:$0xff]  ;;  %v379_v35 = vld [vmem:[%s734_s0 + $0x10] sm:$0xf0]  ;;  %v385_v36 = vld [vmem:[%s734_s0 + $0x8] sm:$0xf] }
  0x16   :  { %304 = vmatpush.bf16.msra.mxu0 %v525_v20  ;;  %v377_v32 = vld [vmem:[%s734_s0] sm:$0xf]  ;;  %v519_v34 = vld [vmem:[%s734_s0 + $0x4] sm:$0xf]  ;;  %v522_v37 = vld [vmem:[%s734_s0 + $0x14] sm:$0xf0] }
  0x17   :  { %318 = vmatpush.bf16.msra.mxu1 %v533_v21  ;;  %v520_v38 = vld [vmem:[%s734_s0 + $0xc] sm:$0xf]  ;;  %v387_v39 = vld [vmem:[%s734_s0 + $0x18] sm:$0xf0]  ;;  %v378_v40 = vor.u32 %v521_v33, %v377_v32  ;;  %v382_v41 = vor.u32 %v519_v34, %v379_v35  ;;  %v386_v42 = vor.u32 %v522_v37, %v385_v36  ;;  %v558_v44 = vld [vmem:[%s736_s2] ss:$0 sm:$0xff] }
  0x18   :  { %332 = vmatpush.bf16.msra.mxu2 %v541_v22  ;;  %v390_v43 = vor.u32 %v520_v38, %v387_v39  ;;  %s585_s0 = smov [#allocation2]   ;;  %s586_s2 = smov 128  }
  0x19   :  { %346 = vmatpush.bf16.msra.mxu3 %v549_v23  ;;  %s361_s12 = sshll.u32 %s585_s0, 4  ;;  %s362_s12 = int_to_ptr.vmem [resolvable:$true] %s361_s12 }
  0x1a   :  { %305 = vmatpush.bf16.msra.mxu0 %v524_v24 }
  0x1b   :  { %319 = vmatpush.bf16.msra.mxu1 %v532_v25 }
  0x1c   :  { %333 = vmatpush.bf16.msra.mxu2 %v540_v26 }
  0x1d   :  { %347 = vmatpush.bf16.msra.mxu3 %v548_v27 }
  0x1e   :  { %306 = vmatpush.bf16.msra.mxu0 %v523_v28 }
  0x1f   :  { %320 = vmatpush.bf16.msra.mxu1 %v531_v29 }
  0x20   :  { %334 = vmatpush.bf16.msra.mxu2 %v539_v30 }
  0x21   :  { %348 = vmatpush.bf16.msra.mxu3 %v547_v31  ;;  %307 = vmatmul.bf16.vlgmr.msra.gmra.mxu0 %v378_v40 }
  0x22   :  { %321 = vmatmul.bf16.vlgmr.msra.gmra.mxu1 %v382_v41 }
  0x23   :  { %335 = vmatmul.bf16.vlgmr.msra.gmra.mxu2 %v386_v42 }
  0x24   :  { %349 = vmatmul.bf16.vlgmr.msra.gmra.mxu3 %v390_v43 }
  0x9e   :  { %v308_v45 = vpop.f32.mrf.mxu0 }
  0x9f   :  { %v309_v46 = vadd.f32 %v558_v44, %v308_v45  ;;  %v322_v47 = vpop.f32.mrf.mxu1 }
  0xa1   :  { %v323_v48 = vadd.f32 %v322_v47, %v309_v46 }
  0xa6   :  { %v336_v49 = vpop.f32.mrf.mxu2  ;;  %v310_v52 = vpop.f32.mrf.mxu0 }
  0xa7   :  { %v350_v50 = vpop.f32.mrf.mxu3  ;;  %v337_v51 = vadd.f32 %v336_v49, %v323_v48  ;;  %v311_v54 = vadd.f32 %v558_v44, %v310_v52  ;;  %v324_v55 = vpop.f32.mrf.mxu1 }
  0xa9   :  { %v351_v53 = vadd.f32 %v350_v50, %v337_v51  ;;  %v325_v56 = vadd.f32 %v324_v55, %v311_v54 }
  0xab   :  { %355 = vst [vmem:[#allocation2] sm:$0xff] %v351_v53 }
  0xae   :  { %v338_v57 = vpop.f32.mrf.mxu2 }
  0xaf   :  { %v339_v58 = vadd.f32 %v338_v57, %v325_v56  ;;  %v352_v59 = vpop.f32.mrf.mxu3 }
  0xb1   :  { %v353_v60 = vadd.f32 %v352_v59, %v339_v58 }
  0xb3   :  { %356 = vst [vmem:[#allocation2 + $0x8] sm:$0xff] %v353_v60 }
  0xb4   :  { %369 = dma.vmem_to_hbm [thread:$0]  %s362_s12, 256, %s364_s15, [#allocation3], %s586_s2, %s586_s2, %s587_s16  }
  0xb5   :  { %583 = dma.done.wait [#allocation3], 256  }
  0xb6   :  { %584 = vsyncadd [#allocation3], 4294967040 }
  0xb7   :  { %374 = vsyncpa [#allocation3], 1 }

</bundles_post_ra>
